<compile_context>
chip_gen: v5e
topology: v5e:2x2
jax: 0.10.0
libtpu: 0.0.40
codegen_flags: <defaults>
</compile_context>

<pallas_src>
import jax
import jax.numpy as jnp
from jax.experimental import pallas as pl
from jax.experimental.pallas import tpu as pltpu


# ----------------------------- kernels ------------------------------------ #

def _mul_kernel(m_ref, e_ref, o_ref):
    # m_ref: (C, tT), e_ref: (C, 1), o_ref: (C, tT); broadcast along lanes (T).
    o_ref[...] = (e_ref[...] * m_ref[...]).astype(o_ref.dtype)


def _mul_add_kernel(m_ref, e_ref, o_ref):
    # m_ref: (C, tT), e_ref: (2, C, 1)  [0] = mul, [1] = add, o_ref: (C, tT).
    # Accumulate in f32 so sub-32-bit inputs keep near-f32 precision.
    m = m_ref[...].astype(jnp.float32)
    e_mul = e_ref[0].astype(jnp.float32)
    e_add = e_ref[1].astype(jnp.float32)
    o_ref[...] = (e_mul * m + e_add).astype(o_ref.dtype)


# ----------------------------- dispatch ------------------------------------ #

_PALLAS_MIN_LANES = 128     # below this every store is masked -> let XLA fuse
_PALLAS_MIN_ELEMS = 4096    # below this launch/per-step overhead dominates


def _pick_tile_t(T):
    """Lane-dense T tile: a multiple of 128 that divides T when possible."""
    if T % 128 == 0:
        for cand in (1024, 512, 256, 128):
            if T % cand == 0:
                return cand
    # Ragged T: short -> single full-extent block; long -> 512-wide lane-dense
    # tiles with a masked tail tile (handled automatically by Pallas).
    return T if T <= 512 else 512


def _adapt_single_pallas(main0, enroll0, do_addition):
    B, C, T = main0.shape
    B_e = enroll0.shape[0]
    tT = _pick_tile_t(T)
    grid = (B, pl.cdiv(T, tT))

    # Leading batch dim squeezed out of the kernel refs.
    main_spec = pl.BlockSpec((None, C, tT), lambda b, t: (b, 0, t))
    out_spec = pl.BlockSpec((None, C, tT), lambda b, t: (b, 0, t))
    out_shape = jax.ShapeDtypeStruct((B, C, T), main0.dtype)

    if do_addition:
        assert enroll0.shape[1] == 2 * C
        # (B_e, 2C) -> (B_e, 2, C, 1): [b, 0] = mul chunk, [b, 1] = add chunk.
        e = enroll0.reshape(B_e, 2, C, 1)
        if B_e == 1:
            e_map = lambda b, t: (0, 0, 0, 0)      # no HBM replication
        else:
            e_map = lambda b, t: (b, 0, 0, 0)
        e_spec = pl.BlockSpec((None, 2, C, 1), e_map)  # resident across T tiles
        kernel = _mul_add_kernel
    else:
        assert enroll0.shape[1] == C
        e = enroll0.reshape(B_e, C, 1)
        if B_e == 1:
            e_map = lambda b, t: (0, 0, 0)
        else:
            e_map = lambda b, t: (b, 0, 0)
        e_spec = pl.BlockSpec((None, C, 1), e_map)
        kernel = _mul_kernel

    return pl.pallas_call(
        kernel,
        out_shape=out_shape,
        grid=grid,
        in_specs=[main_spec, e_spec],
        out_specs=out_spec,
        compiler_params=pltpu.CompilerParams(
            dimension_semantics=("parallel", "parallel")),
    )(main0, e)


def _adapt_single(main0, enroll0, do_addition):
    """main0: (B, C, T); enroll0: (B_e, C) or (B_e, 2C); B_e in {1, B}."""
    B, C, T = main0.shape
    # Tiny tensors: pallas_call launch + ~0.35us/step overhead and fully
    # masked sub-(8,128) stores dominate -> let XLA fuse the broadcast.
    if T < _PALLAS_MIN_LANES or main0.size < _PALLAS_MIN_ELEMS:
        if do_addition:
            e_mul, e_add = enroll0[:, :C], enroll0[:, C:]
            return e_mul[..., None] * main0 + e_add[..., None]
        return enroll0[..., None] * main0
    return _adapt_single_pallas(main0, enroll0, do_addition)


# ----------------------------- module -------------------------------------- #

class MulAddAdaptLayer:
    """JAX/Pallas port of the PyTorch MulAddAdaptLayer."""

    def __init__(self, indim=256, enrolldim=256, ninputs=1, do_addition=False):
        self.ninputs = ninputs
        self.do_addition = do_addition
        assert (do_addition and enrolldim == 2 * indim) or \
               (not do_addition and enrolldim == indim)

    def __call__(self, main, enroll):
        # tuple/list/tensor plumbing (mirrors into_tuple / into_orig_type)
        assert type(main) == type(enroll)
        orig_type = type(main)
        is_seq = isinstance(main, (tuple, list))
        main_t = tuple(main) if is_seq else (main,)
        enroll_t = tuple(enroll) if is_seq else (enroll,)
        assert len(main_t) == len(enroll_t) == self.ninputs
        out = tuple(_adapt_single(m0, e0, self.do_addition)
                    for m0, e0 in zip(main_t, enroll_t))
        if orig_type is tuple:
            return out
        if orig_type is list:
            return list(out)
        return out[0]


# ----------------------------- reference ----------------------------------- #

def _ref_adapt(main0, enroll0, do_addition):
    C = main0.shape[1]
    if do_addition:
        e_mul, e_add = enroll0[:, :C], enroll0[:, C:]
        acc = (e_mul[..., None].astype(jnp.float32) * main0.astype(jnp.float32)
               + e_add[..., None].astype(jnp.float32))
        return acc.astype(main0.dtype)
    return (enroll0[..., None] * main0).astype(main0.dtype)


if __name__ == "__main__":
    key = jax.random.PRNGKey(0)
    k1, k2, k3, k4, k5, k6, k7, k8 = jax.random.split(key, 8)

    # ---------------- Pallas path: lane-dense shapes ---------------- #
    B, C, T = 2, 16, 512
    main = jax.random.normal(k1, (B, C, T), dtype=jnp.float32)

    layer = MulAddAdaptLayer(indim=C, enrolldim=C, ninputs=1, do_addition=False)

    # enroll batch 1 (broadcasts over main batch, no HBM replication)
    enroll_b1 = jax.random.normal(k2, (1, C), dtype=jnp.float32)
    out1 = layer(main, enroll_b1)
    jax.block_until_ready(out1)
    assert out1.shape == (B, C, T)
    assert jnp.allclose(out1, _ref_adapt(main, enroll_b1, False),
                        atol=1e-6, rtol=1e-6)

    # enroll batch B
    enroll_bB = jax.random.normal(k3, (B, C), dtype=jnp.float32)
    out2 = layer(main, enroll_bB)
    jax.block_until_ready(out2)
    assert jnp.allclose(out2, _ref_adapt(main, enroll_bB, False),
                        atol=1e-6, rtol=1e-6)

    # do_addition=True (enrolldim = 2 * indim), single fused enroll operand
    layer_add = MulAddAdaptLayer(indim=C, enrolldim=2 * C, ninputs=1,
                                 do_addition=True)
    enroll_ma = jax.random.normal(k4, (B, 2 * C), dtype=jnp.float32)
    out3 = layer_add(main, enroll_ma)
    jax.block_until_ready(out3)
    assert jnp.allclose(out3, _ref_adapt(main, enroll_ma, True),
                        atol=1e-6, rtol=1e-6)

    # Ragged T (masked tail tile): T=600 -> tT=512 + masked 88-lane tail
    T_r = 600
    main_r = jax.random.normal(k5, (B, C, T_r), dtype=jnp.float32)
    out4 = layer(main_r, enroll_bB)
    jax.block_until_ready(out4)
    assert out4.shape == (B, C, T_r)
    assert jnp.allclose(out4, _ref_adapt(main_r, enroll_bB, False),
                        atol=1e-6, rtol=1e-6)

    # bf16 path (halves HBM traffic; f32 accumulate inside the kernel)
    main_bf = jax.random.normal(k6, (B, C, T), dtype=jnp.bfloat16)
    enroll_bf = jax.random.normal(k7, (B, 2 * C), dtype=jnp.bfloat16)
    out5 = layer_add(main_bf, enroll_bf)
    jax.block_until_ready(out5)
    assert out5.dtype == jnp.bfloat16
    assert jnp.allclose(out5.astype(jnp.float32),
                        _ref_adapt(main_bf, enroll_bf, True).astype(jnp.float32),
                        atol=1e-2, rtol=1e-2)

    # ---------------- Tiny shapes: XLA-fused bypass path ---------------- #
    Bs, Cs, Ts = 2, 4, 16
    main_s = jax.random.normal(k8, (Bs, Cs, Ts), dtype=jnp.float32)
    layer_s = MulAddAdaptLayer(indim=Cs, enrolldim=Cs, ninputs=1,
                               do_addition=False)
    enroll_s1 = jax.random.normal(k2, (1, Cs), dtype=jnp.float32)
    enroll_sB = jax.random.normal(k3, (Bs, Cs), dtype=jnp.float32)
    out6 = layer_s(main_s, enroll_s1)
    out7 = layer_s([main_s], [enroll_sB])       # list plumbing
    jax.block_until_ready(out6)
    jax.block_until_ready(out7)
    assert isinstance(out7, list) and len(out7) == 1
    assert jnp.allclose(out6, _ref_adapt(main_s, enroll_s1, False),
                        atol=1e-6, rtol=1e-6)
    assert jnp.allclose(out7[0], _ref_adapt(main_s, enroll_sB, False),
                        atol=1e-6, rtol=1e-6)

    print("KERNEL_OK")
</pallas_src>

<mosaic_0001>
module attributes {stable_mosaic.version = 11 : i64} {
  func.func @_mul_kernel(%arg0: i32, %arg1: i32, %arg2: memref<1x16x512xf32, #tpu.memory_space<vmem>>, %arg3: memref<1x16x1xf32, #tpu.memory_space<vmem>>, %arg4: memref<1x16x512xf32, #tpu.memory_space<vmem>>) attributes {dimension_semantics = [#tpu.dimension_semantics<parallel>, #tpu.dimension_semantics<parallel>], iteration_bounds = array<i64: 2, 1>, scalar_prefetch = 0 : i64, scratch_operands = 0 : i64, tpu.core_type = #tpu.core_type<tc>, window_params = [{transform_indices = @transform_0, window_bounds = array<i64: 1, 16, 512>}, {pipeline_mode = #tpu.pipeline_mode<synchronous>, transform_indices = @transform_1, window_bounds = array<i64: 1, 16, 1>}, {transform_indices = @transform_2, window_bounds = array<i64: 1, 16, 512>}]} {
    %c0 = arith.constant 0 : index
    %c0_0 = arith.constant 0 : index
    %c0_1 = arith.constant 0 : index
    %0 = vector.load %arg3[%c0, %c0_0, %c0_1] : memref<1x16x1xf32, #tpu.memory_space<vmem>>, vector<1x16x1xf32>
    %1 = vector.shape_cast %0 : vector<1x16x1xf32> to vector<16x1xf32>
    %c0_2 = arith.constant 0 : index
    %c0_3 = arith.constant 0 : index
    %c0_4 = arith.constant 0 : index
    %2 = vector.load %arg2[%c0_2, %c0_3, %c0_4] : memref<1x16x512xf32, #tpu.memory_space<vmem>>, vector<1x16x512xf32>
    %3 = vector.shape_cast %2 : vector<1x16x512xf32> to vector<16x512xf32>
    %4 = vector.broadcast %1 : vector<16x1xf32> to vector<16x512xf32>
    %5 = arith.mulf %4, %3 : vector<16x512xf32>
    %c0_5 = arith.constant 0 : index
    %c0_6 = arith.constant 0 : index
    %c0_7 = arith.constant 0 : index
    %6 = vector.load %arg4[%c0_5, %c0_6, %c0_7] : memref<1x16x512xf32, #tpu.memory_space<vmem>>, vector<1x16x512xf32>
    %7 = vector.shape_cast %6 : vector<1x16x512xf32> to vector<16x512xf32>
    %8 = vector.shape_cast %5 : vector<16x512xf32> to vector<1x16x512xf32>
    tpu.vector_store %arg4[%c0_5, %c0_6, %c0_7], %8 {strides = array<i32>} : memref<1x16x512xf32, #tpu.memory_space<vmem>>, vector<1x16x512xf32>,
    return
  }
  func.func @transform_0(%arg0: i32, %arg1: i32) -> (i32, i32, i32) {
    %c0_i32 = arith.constant 0 : i32
    %c0_i32_0 = arith.constant 0 : i32
    return %arg0, %c0_i32, %arg1 : i32, i32, i32
  }
  func.func @transform_1(%arg0: i32, %arg1: i32) -> (i32, i32, i32) {
    %c0_i32 = arith.constant 0 : i32
    %c0_i32_0 = arith.constant 0 : i32
    %c0_i32_1 = arith.constant 0 : i32
    %c0_i32_2 = arith.constant 0 : i32
    return %c0_i32, %c0_i32_0, %c0_i32_1 : i32, i32, i32
  }
  func.func @transform_2(%arg0: i32, %arg1: i32) -> (i32, i32, i32) {
    %c0_i32 = arith.constant 0 : i32
    %c0_i32_0 = arith.constant 0 : i32
    return %arg0, %c0_i32, %arg1 : i32, i32, i32
  }
}

</mosaic_0001>

<bundles_post_ra>
// kernel: tpu_custom_call.1
= control target key start
LH: loop header
LB: loop body
LE: loop exit
PB: predicated region body
PF: predicated region fallthrough
CT: control target
= control target key end

     0   :  { %7 = vsyncpa [#allocation3], 0  ;;  %s670_s0 = inlined_call_operand.hbm [shape: f32[2,16,512], index: 0, kind: input, shape index: {}]   ;;  %s671_s1 = inlined_call_operand.vmem [shape: f32[1,16,1], index: 1, kind: input, shape index: {}]   ;;  %s672_s2 = inlined_call_operand.hbm [shape: f32[2,16,512], index: 2, kind: output, shape index: {}]  }
   0x1   :  { %9 = vsyncpa [#allocation3 + $0x1], 0 }
   0x2   :  { %10 = vsyncpa [#allocation4], 0 }
   0x3   :  { %12 = vsyncpa [#allocation4 + $0x1], 0  ;;  %s544_s9 = smov 0   ;;  %s546_s10 = smov 0  }
   0x4   :  { %s548_s11 = smov 0   ;;  %s550_s12 = smov 0  }
   0x5   :  { %s552_s13 = smov 0   ;;  %s554_s14 = smov 0  }
   0x6 LB: > { %s325_s15 = sadd.s32 4294967295, %s522_s14   ;;  %s326_s16 = sadd.s32 4294967294, %s522_s14   ;;  %s522_s14 = sphi %s554_s14, %s18_s14   ;;  %s518_s13 = sphi %s552_s13, %s681_s13   ;;  %s514_s12 = sphi %s550_s12, %s680_s12   ;;  %s510_s11 = sphi %s548_s11, %s679_s11   ;;  %s506_s10 = sphi %s546_s10, %s678_s10   ;;  %s502_s9 = sphi %s544_s9, %s677_s9  }
   0x7   : > { %s30_s17 = sadd.s32 1, %s518_s13  ;;  %s39_s18 = sadd.s32 1, %s510_s11 }
   0x8   : > { %p32_p0 = scmp.ge.s32.totalorder %s30_s17, 2  ;;  %p46_p1 = scmp.ne.s32.totalorder %s510_s11, %s506_s10 }
   0x9   : > { %p47_p2 = scmp.eq.s32.totalorder %s522_s14, 0  ;;  %p52_p3 = scmp.ne.s32.totalorder %s506_s10, %s502_s9 }
   0xa   : > { %s683_s17 = smov (%p32_p0, %s30_s17), 0  ;;  %p53_p5 = scmp.eq.s32.totalorder %s325_s15, 0 }
   0xb   : > { %p585_p4 = por %p47_p2, %p46_p1  ;;  %s34_s20 = ssub.s32 %s518_s13, %s683_s17 }
   0xc   : > { %p99_p6 = scmp.eq.s32.totalorder %s325_s15, 1  ;;  %p37_p7 = scmp.eq.s32.totalorder %s34_s20, 0 }
   0xd   : > { %p591_p8 = por %p53_p5, %p52_p3  ;;  %p105_p10 = scmp.eq.s32.totalorder %s326_s16, 1 }
   0xe   : > { %p595_p9 = por %p99_p6, %p46_p1  ;;  %p328_p12 = scmp.ge.s32.totalorder %s522_s14, 2 }
   0xf   : > { %s600_s23 = scalar_select %p37_p7, %s510_s11, %s39_s18  }
  0x10   : > { %p602_p11 = por %p105_p10, %p52_p3  ;;  %p354_p13 = scmp.lt.s32.totalorder %s522_s14, 2 }
  0x11   : > { %s128_s25 = sand.u32 1, %s510_s11   ;;  %s340_s27 = sshll.u32 %s518_s13, 6 }
  0x12   : > { %s329_s26 = sshll.u32 %s128_s25, 6  ;;  %s139_s30 = scalar_lea.hbm %s670_s0, %s340_s27 }
  0x13   : > { %s132_s3 = scalar_lea.vmem [#allocation2], %s329_s26  ;;  %s140_s5 = sshll.u32 %s139_s30, 4  ;;  %s141_s5 = int_to_ptr.hbm [resolvable:$true] %s140_s5 }
  0x14   : > { %s142_s4 = sshll.u32 %s132_s3, 4  ;;  %p347_p0 = pnand %p354_p13, %p585_p4  ;;  %s143_s4 = int_to_ptr.vmem [resolvable:$true] %s142_s4 }
  0x15   : > { %p332_p1 = scmp.ge.s32.totalorder %s522_s14, 1  ;;  %s129_s6 = scalar_lea.sflag [#allocation3], %s128_s25 }
  0x16   : > { %s524_s7 = smov 512   ;;  %s525_s8 = smov 32  }
  0x17   : > { %349 = dma.hbm_to_vmem [thread:$0]  (!%p347_p0), %s141_s5, 1024, %s143_s4, %s129_s6, %s524_s7, %s524_s7, %s525_s8  }
  0x18   : > { %p150_p2 = scmp.lt.s32.totalorder %s522_s14, 3 }
  0x1a   : > { %p151_p3 = pnand %p332_p1, %p150_p2 }
  0x1b   : > { %s618_s15 = sand.u32 (!%p151_p3), 1, %s506_s10  }
  0x1c   : > { %154 = sbr.rel (%p151_p3) target bundleno = 168 (0xa8), region = 28  ;;  %s333_s16 = sshll.u32 (!%p151_p3), %s618_s15, 6 }
  0x1d   : > { %s157_s18 = scalar_lea.sflag (!%p151_p3), [#allocation3], %s618_s15  ;;  %s160_s20 = scalar_lea.vmem (!%p151_p3), [#allocation2], %s333_s16 }
  0x21   : > { %493 = dma.done.wait (%p591_p8), %s157_s18, 1024  }
  0x22   : > { %495 = vsyncadd (%p591_p8), %s157_s18, 4294966272  ;;  %v526_v0 = vmov 0   ;;  %v184_v1 = vld [vmem:[%s671_s1] sm:$0xff]  ;;  %v185_v2 = vld [vmem:[%s671_s1 + $0x8] sm:$0xff]  ;;  %s341_s21 = sshll.u32 %s514_s12, 6  ;;  %s181_s28 = scalar_lea.vmem [#allocation5], %s333_s16 }
  0x23   : > { %409 = vset.pattern.permute.xlu0 %v526_v0  ;;  %v186_v3 = vld [vmem:[%s160_s20] sm:$0xff]  ;;  %v187_v4 = vld [vmem:[%s160_s20 + $0x8] sm:$0xff]  ;;  %v188_v5 = vld [vmem:[%s160_s20 + $0x10] sm:$0xff]  ;;  %s234_s3 = scalar_lea.hbm %s672_s2, %s341_s21  ;;  %s235_s4 = sshll.u32 %s181_s28, 4  ;;  %s236_s4 = int_to_ptr.vmem [resolvable:$true] %s235_s4 }
  0x24   : > { %196 = vperm.xlu0 %409, %v184_v1   ;;  %v189_v6 = vld [vmem:[%s160_s20 + $0x18] sm:$0xff]  ;;  %v190_v12 = vld [vmem:[%s160_s20 + $0x20] sm:$0xff]  ;;  %v191_v13 = vld [vmem:[%s160_s20 + $0x28] sm:$0xff]  ;;  %s237_s5 = sshll.u32 %s234_s3, 4  ;;  %s221_s12 = scalar_lea.sflag [#allocation4], %s618_s15  ;;  %s238_s5 = int_to_ptr.hbm [resolvable:$true] %s237_s5 }
  0x25   : > { %v192_v14 = vld [vmem:[%s160_s20 + $0x30] sm:$0xff]  ;;  %v193_v15 = vld [vmem:[%s160_s20 + $0x38] sm:$0xff]  ;;  %s454_s6 = sshra.s32 %s238_s5, 4  ;;  %s460_s18 = scalar_lea.hbm %s672_s2, 128  ;;  %s455_s6 = int_to_ptr.hbm [resolvable:$true] %s454_s6 }
  0x26   : > { %s456_s7 = scalar_lea.hbm %s455_s6, 64  ;;  %p461_p7 = scmp.lt.s32.totalorder %s455_s6, %s672_s2 }
  0x27   : > { %p457_p4 = scmp.ne.s32.totalorder %s455_s6, %s456_s7  ;;  %p462_p8 = scmp.lt.s32.totalorder %s460_s18, %s456_s7 }
  0x29   : > { %p458_p5 = pnand %p457_p4, %p595_p9  ;;  %p463_p10 = por %p462_p8, %p461_p7 }
  0x2b   : > { %p459_p6 = pneg %p458_p5 }
  0x2c   : > { %201 = vperm.xlu0 %409, %v185_v2  }
  0x2d   : > { %p464_p13 = pnand %p463_p10, %p459_p6 }
  0x96   : > { %v197_v7 = vpop.permute.xlu0 %196 }
  0x97   : > { %v204_v8 = vmul.f32 %v197_v7, %v186_v3  ;;  %v205_v9 = vmul.f32 %v197_v7, %v187_v4  ;;  %v206_v10 = vmul.f32 %v197_v7, %v188_v5  ;;  %v207_v11 = vmul.f32 %v197_v7, %v189_v6 }
  0x99   : > { %212 = vst [vmem:[%s181_s28] sm:$0xff] %v204_v8 }
  0x9a   : > { %213 = vst [vmem:[%s181_s28 + $0x8] sm:$0xff] %v205_v9 }
  0x9b   : > { %214 = vst [vmem:[%s181_s28 + $0x10] sm:$0xff] %v206_v10 }
  0x9c   : > { %215 = vst [vmem:[%s181_s28 + $0x18] sm:$0xff] %v207_v11 }
  0x9e   : > { %v202_v16 = vpop.permute.xlu0 %201 }
  0x9f   : > { %v208_v17 = vmul.f32 %v202_v16, %v190_v12  ;;  %v209_v18 = vmul.f32 %v202_v16, %v191_v13  ;;  %v210_v19 = vmul.f32 %v202_v16, %v192_v14  ;;  %v211_v20 = vmul.f32 %v202_v16, %v193_v15 }
  0xa1   : > { %216 = vst [vmem:[%s181_s28 + $0x20] sm:$0xff] %v208_v17 }
  0xa2   : > { %217 = vst [vmem:[%s181_s28 + $0x28] sm:$0xff] %v209_v18 }
  0xa3   : > { %218 = vst [vmem:[%s181_s28 + $0x30] sm:$0xff] %v210_v19 }
  0xa4   : > { %219 = vst [vmem:[%s181_s28 + $0x38] sm:$0xff] %v211_v20 }
  0xa5   : > { %467 = shalt.err (!%p464_p13)
}
  0xa6   : > { %s527_s15 = smov 512   ;;  %s528_s25 = smov 32  }
  0xa7   : > { %344 = dma.vmem_to_hbm [thread:$0]  (%p595_p9), %s236_s4, 1024, %s238_s5, %s221_s12, %s527_s15, %s527_s15, %s528_s25  }
  0xa8 PF: > { %s252_s26 = sand.u32 1, %s502_s9   ;;  %p351_p0 = pnand %p328_p12, %p602_p11 }
  0xa9   : > { %s253_s27 = scalar_lea.sflag [#allocation4], %s252_s26 }
  0xaa   : > { %p352_p1 = pneg %p351_p0 }
  0xac   : > { %497 = dma.done.wait (%p352_p1), %s253_s27, 1024  }
  0xad   : > { %499 = vsyncadd (%p352_p1), %s253_s27, 4294966272  ;;  %s18_s14 = sadd.s32 1, %s522_s14   ;;  %s677_s9 = smov %s506_s10 }
  0xae   : > { %p15_p2 = scmp.ge.s32.totalorder %s18_s14, 4   ;;  %s678_s10 = smov %s510_s11 }
  0xaf   : > { %s679_s11 = smov %s600_s23  ;;  %s680_s12 = smov %s518_s13 }
  0xb0   : > { %s681_s13 = smov %s683_s17  ;;  %17 = sbr.rel (!%p15_p2) target bundleno = 6 (0x6), region = 73 }
  0xb5   :  { %259 = vsyncpa [#allocation3], 1 }
  0xb6   :  { %261 = vsyncpa [#allocation3 + $0x1], 1 }
  0xb7   :  { %262 = vsyncpa [#allocation4], 1 }
  0xb8   :  { %264 = vsyncpa [#allocation4 + $0x1], 1 }

</bundles_post_ra>
